<compile_context>
chip_gen: v7x
topology: tpu7x:2x2x1
jax: 0.10.0
libtpu: 0.0.40
codegen_flags: <defaults>
</compile_context>

<pallas_src>
import jax
import jax.numpy as jnp
import numpy as np
from jax.experimental import pallas as pl
from jax.experimental.pallas import tpu as pltpu

_EPS = 1e-6          # nn.PairwiseDistance default eps (added to the difference)
_MARGIN_SP = 0.5     # triplet_margin1
_MARGIN_PN = 3.0     # triplet_margin

_VMEM_LIMIT_BYTES = 32 * 1024 * 1024   # explicit scoped-VMEM limit (safe on all gens)
_VMEM_BUDGET_BYTES = 24 * 1024 * 1024  # target working set (leaves headroom under limit)


def _make_kernel(batch, block_rows):
    """Build the per-tile kernel (batch / block_rows are static)."""
    ragged = (batch % block_rows) != 0

    def kernel(dc_ref, a_ref, s_ref, p_ref, n_ref, out_ref):
        i = pl.program_id(0)

        a = a_ref[...].astype(jnp.float32)
        s = s_ref[...].astype(jnp.float32)
        p = p_ref[...].astype(jnp.float32)
        n = n_ref[...].astype(jnp.float32)

        def pdist(x, y):
            # PyTorch PairwiseDistance: ||x - y + eps||_2 per row -> (TB, 1)
            d = x - y + _EPS
            return jnp.sqrt(jnp.sum(d * d, axis=-1, keepdims=True))

        d_as = pdist(a, s)
        d_ap = pdist(a, p)
        d_an = pdist(a, n)

        dc0 = dc_ref[0]
        dc1 = dc_ref[1]
        dc2 = dc_ref[2]

        if ragged:
            # Mask rows of the ragged last block (they read undefined data;
            # jnp.where SELECTS, so any Inf/NaN there never propagates).
            row = i * block_rows + jax.lax.broadcasted_iota(
                jnp.int32, (block_rows, 1), 0)
            valid = row < batch

            def mask(x):
                return jnp.where(valid, x, 0.0)
        else:
            def mask(x):
                return x

        e_as = jnp.sum(mask((dc0 - d_as) ** 2))
        e_ap = jnp.sum(mask((dc1 - d_ap) ** 2))
        e_an = jnp.sum(mask((dc2 - d_an) ** 2))
        t_sp = jnp.sum(mask(jnp.maximum(d_as - d_ap + _MARGIN_SP, 0.0)))
        t_pn = jnp.sum(mask(jnp.maximum(d_ap - d_an + _MARGIN_PN, 0.0)))

        # Lane-dense per-tile partials: partial sums live in lanes 0..4
        # (replicated across the 8 sublanes; the wrapper reads sublane 0).
        lane = jax.lax.broadcasted_iota(jnp.int32, (1, 8, 128), 2)
        out_ref[...] = (jnp.where(lane == 0, e_as, 0.0)
                        + jnp.where(lane == 1, e_ap, 0.0)
                        + jnp.where(lane == 2, e_an, 0.0)
                        + jnp.where(lane == 3, t_sp, 0.0)
                        + jnp.where(lane == 4, t_pn, 0.0))

    return kernel


def _choose_block_rows(batch, feat, itemsize):
    """Pick a batch-tile size from a VMEM working-set budget (all generations).

    The per-row footprint counts the 4 double-buffered input tiles in their
    native dtype PLUS ~6 (tb, D) float32 slabs for the in-kernel f32 upcasts
    and the (x - y + eps) / squared-difference temporaries — i.e. the real
    VMEM footprint, not just the raw DMA buffers (important on v7x: 64 MiB
    physical / 32 MiB scoped VMEM).
    """
    per_row = 4 * 2 * feat * itemsize + 6 * feat * 4
    tb = _VMEM_BUDGET_BYTES // max(per_row, 1)
    tb = (tb // 8) * 8                        # multiple of 8 sublanes
    tb = max(8, min(4096, tb))
    # Guarantee >= ~4 grid tiles when the batch allows it, so v7x's two
    # TensorCores (batch axis is "parallel") both get work and the DMA/compute
    # pipeline always has a next tile in flight.
    par_cap = max(8, ((-(-batch // 4)) + 7) // 8 * 8)
    return int(min(tb, par_cap))


def hk_final_loss(a, s, p, n, dis_center):
    """Returns (loss, (c_loss, trip_loss)) exactly like the PyTorch module."""
    assert a.shape == s.shape == p.shape == n.shape and a.ndim == 2
    B, D = a.shape
    dis_center = dis_center.astype(jnp.float32)

    tb = _choose_block_rows(B, D, jnp.dtype(a.dtype).itemsize)
    num_tiles = -(-B // tb)                  # cdiv; last tile may be ragged (masked)

    kernel = _make_kernel(B, tb)
    emb_spec = pl.BlockSpec((tb, D), lambda i: (i, 0))

    partials = pl.pallas_call(
        kernel,
        out_shape=jax.ShapeDtypeStruct((num_tiles, 8, 128), jnp.float32),
        grid=(num_tiles,),
        in_specs=[pl.BlockSpec(memory_space=pltpu.MemorySpace.SMEM),
                  emb_spec, emb_spec, emb_spec, emb_spec],
        out_specs=pl.BlockSpec((1, 8, 128), lambda i: (i, 0, 0)),
        compiler_params=pltpu.CompilerParams(
            dimension_semantics=("parallel",),
            vmem_limit_bytes=_VMEM_LIMIT_BYTES),
    )(dis_center, a, s, p, n)

    # Tiny final reduction in the wrapper (sublane 0 holds the partial sums).
    sums = jnp.sum(partials[:, 0, :], axis=0)
    c_loss = (sums[0] + sums[1] + sums[2]) / B
    trip_loss = (sums[3] + sums[4]) / B
    loss = 2.0 * c_loss + trip_loss
    return loss, (c_loss, trip_loss)


hk_final_loss_jit = jax.jit(hk_final_loss)


def final_loss_forward(outputs, lb=None):
    """API-parity wrapper mirroring final_loss.forward(outputs, lb)."""
    a, s, p, n, dis_center = outputs[1], outputs[2], outputs[3], outputs[4], outputs[5]
    return hk_final_loss_jit(a, s, p, n, dis_center)


def _reference(a, s, p, n, dc):
    """Pure-JAX reference matching the PyTorch forward."""

    def dist(x, y):
        return jnp.sqrt(jnp.sum((x - y + _EPS) ** 2, axis=-1))

    def mse(t, pr):
        return jnp.mean((t - pr) ** 2)

    d_as, d_ap, d_an = dist(a, s), dist(a, p), dist(a, n)
    c_loss = mse(dc[0], d_as) + mse(dc[1], d_ap) + mse(dc[2], d_an)
    trip_loss = (jnp.mean(jnp.maximum(d_as - d_ap + _MARGIN_SP, 0.0))
                 + jnp.mean(jnp.maximum(d_ap - d_an + _MARGIN_PN, 0.0)))
    loss = 2.0 * c_loss + trip_loss
    return loss, c_loss, trip_loss


if __name__ == "__main__":
    B, D = 16, 128
    key = jax.random.PRNGKey(0)
    ks = jax.random.split(key, 5)
    a = jax.random.normal(ks[0], (B, D), dtype=jnp.float32)
    s = a + 0.1 * jax.random.normal(ks[1], (B, D), dtype=jnp.float32)
    p = jax.random.normal(ks[2], (B, D), dtype=jnp.float32)
    n = jax.random.normal(ks[3], (B, D), dtype=jnp.float32)
    dis_center = jax.random.uniform(ks[4], (3,), dtype=jnp.float32,
                                    minval=1.0, maxval=5.0)

    loss, (c_loss, trip_loss) = hk_final_loss_jit(a, s, p, n, dis_center)
    jax.block_until_ready(loss)

    ref_loss, ref_c, ref_t = _reference(a, s, p, n, dis_center)
    np.testing.assert_allclose(np.asarray(loss), np.asarray(ref_loss),
                               rtol=2e-5, atol=1e-4)
    np.testing.assert_allclose(np.asarray(c_loss), np.asarray(ref_c),
                               rtol=2e-5, atol=1e-4)
    np.testing.assert_allclose(np.asarray(trip_loss), np.asarray(ref_t),
                               rtol=2e-5, atol=1e-4)

    # Ragged batch exercises the no-pad / masked last-tile path.
    B2 = 13
    loss2, (c2, t2) = hk_final_loss_jit(a[:B2], s[:B2], p[:B2], n[:B2],
                                        dis_center)
    jax.block_until_ready(loss2)
    rl2, rc2, rt2 = _reference(a[:B2], s[:B2], p[:B2], n[:B2], dis_center)
    np.testing.assert_allclose(np.asarray(loss2), np.asarray(rl2),
                               rtol=2e-5, atol=1e-4)
    np.testing.assert_allclose(np.asarray(c2), np.asarray(rc2),
                               rtol=2e-5, atol=1e-4)
    np.testing.assert_allclose(np.asarray(t2), np.asarray(rt2),
                               rtol=2e-5, atol=1e-4)

    print("KERNEL_OK")
</pallas_src>

<mosaic_0001>
module attributes {stable_mosaic.version = 11 : i64} {
  func.func @kernel(%arg0: i32, %arg1: memref<3xf32, #tpu.memory_space<smem>>, %arg2: memref<8x128xf32, #tpu.memory_space<vmem>>, %arg3: memref<8x128xf32, #tpu.memory_space<vmem>>, %arg4: memref<8x128xf32, #tpu.memory_space<vmem>>, %arg5: memref<8x128xf32, #tpu.memory_space<vmem>>, %arg6: memref<1x8x128xf32, #tpu.memory_space<vmem>>) attributes {dimension_semantics = [#tpu.dimension_semantics<parallel>], iteration_bounds = array<i64: 2>, scalar_prefetch = 0 : i64, scratch_operands = 0 : i64, tpu.core_type = #tpu.core_type<tc>, window_params = [{transform_indices = @transform_0, window_bounds = array<i64: 3>}, {transform_indices = @transform_1, window_bounds = array<i64: 8, 128>}, {transform_indices = @transform_2, window_bounds = array<i64: 8, 128>}, {transform_indices = @transform_3, window_bounds = array<i64: 8, 128>}, {transform_indices = @transform_4, window_bounds = array<i64: 8, 128>}, {transform_indices = @transform_5, window_bounds = array<i64: 1, 8, 128>}]} {
    %c0 = arith.constant 0 : index
    %c0_0 = arith.constant 0 : index
    %0 = vector.load %arg2[%c0, %c0_0] : memref<8x128xf32, #tpu.memory_space<vmem>>, vector<8x128xf32>
    %c0_1 = arith.constant 0 : index
    %c0_2 = arith.constant 0 : index
    %1 = vector.load %arg3[%c0_1, %c0_2] : memref<8x128xf32, #tpu.memory_space<vmem>>, vector<8x128xf32>
    %c0_3 = arith.constant 0 : index
    %c0_4 = arith.constant 0 : index
    %2 = vector.load %arg4[%c0_3, %c0_4] : memref<8x128xf32, #tpu.memory_space<vmem>>, vector<8x128xf32>
    %c0_5 = arith.constant 0 : index
    %c0_6 = arith.constant 0 : index
    %3 = vector.load %arg5[%c0_5, %c0_6] : memref<8x128xf32, #tpu.memory_space<vmem>>, vector<8x128xf32>
    %4 = arith.subf %0, %1 : vector<8x128xf32>
    %cst = arith.constant 9.99999997E-7 : f32
    %5 = vector.broadcast %cst : f32 to vector<8x128xf32>
    %6 = arith.addf %4, %5 : vector<8x128xf32>
    %7 = arith.mulf %6, %6 : vector<8x128xf32>
    %cst_7 = arith.constant dense<0.000000e+00> : vector<8xf32>
    %8 = vector.multi_reduction <add>, %7, %cst_7 [1] : vector<8x128xf32> to vector<8xf32>
    %9 = vector.shape_cast %8 : vector<8xf32> to vector<8x1xf32>
    %10 = math.sqrt %9 : vector<8x1xf32>
    %11 = arith.subf %0, %2 : vector<8x128xf32>
    %cst_8 = arith.constant 9.99999997E-7 : f32
    %12 = vector.broadcast %cst_8 : f32 to vector<8x128xf32>
    %13 = arith.addf %11, %12 : vector<8x128xf32>
    %14 = arith.mulf %13, %13 : vector<8x128xf32>
    %cst_9 = arith.constant dense<0.000000e+00> : vector<8xf32>
    %15 = vector.multi_reduction <add>, %14, %cst_9 [1] : vector<8x128xf32> to vector<8xf32>
    %16 = vector.shape_cast %15 : vector<8xf32> to vector<8x1xf32>
    %17 = math.sqrt %16 : vector<8x1xf32>
    %18 = arith.subf %0, %3 : vector<8x128xf32>
    %cst_10 = arith.constant 9.99999997E-7 : f32
    %19 = vector.broadcast %cst_10 : f32 to vector<8x128xf32>
    %20 = arith.addf %18, %19 : vector<8x128xf32>
    %21 = arith.mulf %20, %20 : vector<8x128xf32>
    %cst_11 = arith.constant dense<0.000000e+00> : vector<8xf32>
    %22 = vector.multi_reduction <add>, %21, %cst_11 [1] : vector<8x128xf32> to vector<8xf32>
    %23 = vector.shape_cast %22 : vector<8xf32> to vector<8x1xf32>
    %24 = math.sqrt %23 : vector<8x1xf32>
    %c0_12 = arith.constant 0 : index
    %25 = memref.load %arg1[%c0_12] : memref<3xf32, #tpu.memory_space<smem>>
    %c1 = arith.constant 1 : index
    %26 = memref.load %arg1[%c1] : memref<3xf32, #tpu.memory_space<smem>>
    %c2 = arith.constant 2 : index
    %27 = memref.load %arg1[%c2] : memref<3xf32, #tpu.memory_space<smem>>
    %28 = vector.broadcast %25 : f32 to vector<8x1xf32>
    %29 = arith.subf %28, %10 : vector<8x1xf32>
    %30 = arith.mulf %29, %29 : vector<8x1xf32>
    %31 = vector.shape_cast %30 : vector<8x1xf32> to vector<1x8x1xf32>
    %cst_13 = arith.constant dense<0.000000e+00> : vector<1xf32>
    %32 = vector.multi_reduction <add>, %31, %cst_13 [1, 2] : vector<1x8x1xf32> to vector<1xf32>
    %33 = vector.shape_cast %32 : vector<1xf32> to vector<1x1x1xf32>
    %34 = vector.extract %33[0, 0, 0] : f32 from vector<1x1x1xf32>
    %35 = vector.broadcast %26 : f32 to vector<8x1xf32>
    %36 = arith.subf %35, %17 : vector<8x1xf32>
    %37 = arith.mulf %36, %36 : vector<8x1xf32>
    %38 = vector.shape_cast %37 : vector<8x1xf32> to vector<1x8x1xf32>
    %cst_14 = arith.constant dense<0.000000e+00> : vector<1xf32>
    %39 = vector.multi_reduction <add>, %38, %cst_14 [1, 2] : vector<1x8x1xf32> to vector<1xf32>
    %40 = vector.shape_cast %39 : vector<1xf32> to vector<1x1x1xf32>
    %41 = vector.extract %40[0, 0, 0] : f32 from vector<1x1x1xf32>
    %42 = vector.broadcast %27 : f32 to vector<8x1xf32>
    %43 = arith.subf %42, %24 : vector<8x1xf32>
    %44 = arith.mulf %43, %43 : vector<8x1xf32>
    %45 = vector.shape_cast %44 : vector<8x1xf32> to vector<1x8x1xf32>
    %cst_15 = arith.constant dense<0.000000e+00> : vector<1xf32>
    %46 = vector.multi_reduction <add>, %45, %cst_15 [1, 2] : vector<1x8x1xf32> to vector<1xf32>
    %47 = vector.shape_cast %46 : vector<1xf32> to vector<1x1x1xf32>
    %48 = vector.extract %47[0, 0, 0] : f32 from vector<1x1x1xf32>
    %49 = arith.subf %10, %17 : vector<8x1xf32>
    %cst_16 = arith.constant 5.000000e-01 : f32
    %50 = vector.broadcast %cst_16 : f32 to vector<8x1xf32>
    %51 = arith.addf %49, %50 : vector<8x1xf32>
    %cst_17 = arith.constant 0.000000e+00 : f32
    %52 = vector.broadcast %cst_17 : f32 to vector<8x1xf32>
    %53 = arith.maximumf %51, %52 : vector<8x1xf32>
    %54 = vector.shape_cast %53 : vector<8x1xf32> to vector<1x8x1xf32>
    %cst_18 = arith.constant dense<0.000000e+00> : vector<1xf32>
    %55 = vector.multi_reduction <add>, %54, %cst_18 [1, 2] : vector<1x8x1xf32> to vector<1xf32>
    %56 = vector.shape_cast %55 : vector<1xf32> to vector<1x1x1xf32>
    %57 = vector.extract %56[0, 0, 0] : f32 from vector<1x1x1xf32>
    %58 = arith.subf %17, %24 : vector<8x1xf32>
    %cst_19 = arith.constant 3.000000e+00 : f32
    %59 = vector.broadcast %cst_19 : f32 to vector<8x1xf32>
    %60 = arith.addf %58, %59 : vector<8x1xf32>
    %cst_20 = arith.constant 0.000000e+00 : f32
    %61 = vector.broadcast %cst_20 : f32 to vector<8x1xf32>
    %62 = arith.maximumf %60, %61 : vector<8x1xf32>
    %63 = vector.shape_cast %62 : vector<8x1xf32> to vector<1x8x1xf32>
    %cst_21 = arith.constant dense<0.000000e+00> : vector<1xf32>
    %64 = vector.multi_reduction <add>, %63, %cst_21 [1, 2] : vector<1x8x1xf32> to vector<1xf32>
    %65 = vector.shape_cast %64 : vector<1xf32> to vector<1x1x1xf32>
    %66 = vector.extract %65[0, 0, 0] : f32 from vector<1x1x1xf32>
    %67 = tpu.iota {dimensions = array<i32: 2>} : vector<1x8x128xi32>
    %c0_i32 = arith.constant 0 : i32
    %68 = vector.broadcast %c0_i32 : i32 to vector<1x8x128xi32>
    %69 = arith.cmpi eq, %67, %68 : vector<1x8x128xi32>
    %cst_22 = arith.constant 0.000000e+00 : f32
    %70 = vector.broadcast %34 : f32 to vector<1x8x128xf32>
    %71 = vector.broadcast %cst_22 : f32 to vector<1x8x128xf32>
    %72 = arith.select %69, %70, %71 : vector<1x8x128xi1>, vector<1x8x128xf32>
    %c1_i32 = arith.constant 1 : i32
    %73 = vector.broadcast %c1_i32 : i32 to vector<1x8x128xi32>
    %74 = arith.cmpi eq, %67, %73 : vector<1x8x128xi32>
    %cst_23 = arith.constant 0.000000e+00 : f32
    %75 = vector.broadcast %41 : f32 to vector<1x8x128xf32>
    %76 = vector.broadcast %cst_23 : f32 to vector<1x8x128xf32>
    %77 = arith.select %74, %75, %76 : vector<1x8x128xi1>, vector<1x8x128xf32>
    %78 = arith.addf %72, %77 : vector<1x8x128xf32>
    %c2_i32 = arith.constant 2 : i32
    %79 = vector.broadcast %c2_i32 : i32 to vector<1x8x128xi32>
    %80 = arith.cmpi eq, %67, %79 : vector<1x8x128xi32>
    %cst_24 = arith.constant 0.000000e+00 : f32
    %81 = vector.broadcast %48 : f32 to vector<1x8x128xf32>
    %82 = vector.broadcast %cst_24 : f32 to vector<1x8x128xf32>
    %83 = arith.select %80, %81, %82 : vector<1x8x128xi1>, vector<1x8x128xf32>
    %84 = arith.addf %78, %83 : vector<1x8x128xf32>
    %c3_i32 = arith.constant 3 : i32
    %85 = vector.broadcast %c3_i32 : i32 to vector<1x8x128xi32>
    %86 = arith.cmpi eq, %67, %85 : vector<1x8x128xi32>
    %cst_25 = arith.constant 0.000000e+00 : f32
    %87 = vector.broadcast %57 : f32 to vector<1x8x128xf32>
    %88 = vector.broadcast %cst_25 : f32 to vector<1x8x128xf32>
    %89 = arith.select %86, %87, %88 : vector<1x8x128xi1>, vector<1x8x128xf32>
    %90 = arith.addf %84, %89 : vector<1x8x128xf32>
    %c4_i32 = arith.constant 4 : i32
    %91 = vector.broadcast %c4_i32 : i32 to vector<1x8x128xi32>
    %92 = arith.cmpi eq, %67, %91 : vector<1x8x128xi32>
    %cst_26 = arith.constant 0.000000e+00 : f32
    %93 = vector.broadcast %66 : f32 to vector<1x8x128xf32>
    %94 = vector.broadcast %cst_26 : f32 to vector<1x8x128xf32>
    %95 = arith.select %92, %93, %94 : vector<1x8x128xi1>, vector<1x8x128xf32>
    %96 = arith.addf %90, %95 : vector<1x8x128xf32>
    %c0_27 = arith.constant 0 : index
    %c0_28 = arith.constant 0 : index
    %c0_29 = arith.constant 0 : index
    %97 = vector.load %arg6[%c0_27, %c0_28, %c0_29] : memref<1x8x128xf32, #tpu.memory_space<vmem>>, vector<1x8x128xf32>
    tpu.vector_store %arg6[%c0_27, %c0_28, %c0_29], %96 {strides = array<i32>} : memref<1x8x128xf32, #tpu.memory_space<vmem>>, vector<1x8x128xf32>,
    return
  }
  func.func @transform_0(%arg0: i32) -> i32 {
    %c0_i32 = arith.constant 0 : i32
    %c0_i32_0 = arith.constant 0 : i32
    return %c0_i32 : i32
  }
  func.func @transform_1(%arg0: i32) -> (i32, i32) {
    %c0_i32 = arith.constant 0 : i32
    %c0_i32_0 = arith.constant 0 : i32
    return %arg0, %c0_i32 : i32, i32
  }
  func.func @transform_2(%arg0: i32) -> (i32, i32) {
    %c0_i32 = arith.constant 0 : i32
    %c0_i32_0 = arith.constant 0 : i32
    return %arg0, %c0_i32 : i32, i32
  }
  func.func @transform_3(%arg0: i32) -> (i32, i32) {
    %c0_i32 = arith.constant 0 : i32
    %c0_i32_0 = arith.constant 0 : i32
    return %arg0, %c0_i32 : i32, i32
  }
  func.func @transform_4(%arg0: i32) -> (i32, i32) {
    %c0_i32 = arith.constant 0 : i32
    %c0_i32_0 = arith.constant 0 : i32
    return %arg0, %c0_i32 : i32, i32
  }
  func.func @transform_5(%arg0: i32) -> (i32, i32, i32) {
    %c0_i32 = arith.constant 0 : i32
    %c0_i32_0 = arith.constant 0 : i32
    %c0_i32_1 = arith.constant 0 : i32
    return %arg0, %c0_i32, %c0_i32_0 : i32, i32, i32
  }
}

</mosaic_0001>

<bundles_post_ra>
// kernel: hk_final_loss.1
= control target key start
LH: loop header
LB: loop body
LE: loop exit
PB: predicated region body
PF: predicated region fallthrough
CT: control target
= control target key end

     0   :  { %s1202_s0 = inlined_call_operand.vmem [shape: f32[3], index: 0, kind: input, shape index: {}]   ;;  %s1203_s1 = inlined_call_operand.hbm [shape: f32[16,128], index: 1, kind: input, shape index: {}]   ;;  %s1204_s2 = inlined_call_operand.hbm [shape: f32[16,128], index: 2, kind: input, shape index: {}]   ;;  %s1205_s3 = inlined_call_operand.hbm [shape: f32[16,128], index: 3, kind: input, shape index: {}]   ;;  %s1206_s4 = inlined_call_operand.hbm [shape: f32[16,128], index: 4, kind: input, shape index: {}]   ;;  %s1207_s5 = inlined_call_operand.vmem [shape: f32[2,8,128], index: 5, kind: output, shape index: {}]  }
   0x1   :  { %1214 = sst [smem:[#allocation15_spill]] %s1202_s0 }
   0x2   :  { %1215 = sst [smem:[#allocation16_spill]] %s1204_s2 }
   0x3   :  { %10 = vsyncpa [#allocation4], 0 }
   0x4   :  { %11 = vsyncpa [#allocation3], 0 }
   0x5   :  { %13 = vsyncpa [#allocation3 + $0x1], 0 }
   0x6   :  { %14 = vsyncpa [#allocation7], 0 }
   0x7   :  { %16 = vsyncpa [#allocation7 + $0x1], 0 }
   0x8   :  { %17 = vsyncpa [#allocation10], 0 }
   0x9   :  { %19 = vsyncpa [#allocation10 + $0x1], 0  ;;  %s958_s18 = smov 0   ;;  %s960_s19 = smov 0  }
   0xa   :  { %s962_s20 = smov 0   ;;  %s964_s21 = smov 0  }
   0xb LB: > { %s979_s22 = sadd.s32 1, %s921_s21   ;;  %s53_s23 = sadd.s32 1, %s917_s20  ;;  %s921_s21 = sphi %s964_s21, %s1234_s21   ;;  %s917_s20 = sphi %s962_s20, %s1233_s20   ;;  %s913_s19 = sphi %s960_s19, %s1232_s19   ;;  %s909_s18 = sphi %s958_s18, %s1231_s18  }
   0xc   : > { %s50_s24 = ssub.s32 %s921_s21, %s979_s22  ;;  %p60_p0 = scmp.ne.s32.totalorder %s917_s20, %s913_s19 }
   0xd   : > { %p51_p1 = scmp.eq.s32.totalorder %s50_s24, 0  ;;  %p61_p2 = scmp.eq.s32.totalorder %s921_s21, 0 }
   0xe   : > { %p699_p3 = scmp.lt.s32.totalorder %s921_s21, 2  ;;  %s992_s26 = sand.u32 1, %s917_s20  }
   0xf   : > { %s989_s25 = scalar_select %p51_p1, %s917_s20, %s53_s23  }
  0x10   : > { %p62_p4 = por %p61_p2, %p60_p0  ;;  %s995_s27 = sshll.u32 %s992_s26, 3 }
  0x11   : > { %s998_s28 = sshll.u32 %s921_s21, 7  ;;  %s223_s30 = sand.u32 1, %s921_s21  }
  0x12   : > { %p1000_p5 = pnand %p699_p3, %p62_p4  ;;  %s1217_s2 = sld [smem:[#allocation16_spill]] }
  0x13   : > { %s227_s9 = scalar_lea.vmem [#allocation6], %s995_s27  ;;  %s1014_s11 = scalar_lea.sflag [#allocation7], %s223_s30 }
  0x14   : > { %s1216_s29 = scalar_select %p1000_p5, 1, 0 }
  0x15   : > { %s234_s10 = sshll.u32 %s227_s9, 4  ;;  %p1020_p7 = pneg %p1000_p5  ;;  %s1012_s10 = int_to_ptr.vmem [resolvable:$true] %s234_s10 }
  0x18   : > { %s1009_s8 = scalar_lea.hbm %s1217_s2, %s998_s28  ;;  %s745_s16 = scalar_lea.hbm %s1217_s2, 256 }
  0x19   : > { %s740_s12 = scalar_lea.hbm %s1009_s8, 128  ;;  %p746_p10 = scmp.lt.u32.totalorder %s1009_s8, %s1217_s2 }
  0x1a   : > { %p741_p6 = scmp.ne.s32.totalorder %s1009_s8, %s740_s12  ;;  %p747_p11 = scmp.lt.u32.totalorder %s745_s16, %s740_s12 }
  0x1b   : > { %p749_p13 = scmp.lt.u32.totalorder %s740_s12, %s1009_s8 }
  0x1c   : > { %p743_p8 = pnand %p1020_p7, %p741_p6  ;;  %p748_p12 = por %p747_p11, %p746_p10 }
  0x1e   : > { %p744_p9 = pneg %p743_p8  ;;  %p750_p0 = por %p749_p13, %p748_p12 }
  0x20   : > { %p751_p1 = pnand %p750_p0, %p744_p9 }
  0x22   : > { %754 = shalt.err (!%p751_p1)
}
  0x23   : > { %s755_s24 = scalar_lea.vmem %s1012_s10, 128  ;;  %s923_s30 = smov [#allocation6]  }
  0x24   : > { %p756_p2 = scmp.ne.s32.totalorder %s1012_s10, %s755_s24  ;;  %s760_s6 = sshll.u32 %s923_s30, 4  ;;  %s761_s6 = int_to_ptr.vmem [resolvable:$false] %s760_s6 }
  0x25   : > { %s762_s7 = scalar_lea.vmem %s761_s6, 256  ;;  %p763_p6 = scmp.lt.s32.totalorder %s1012_s10, %s761_s6 }
  0x26   : > { %p758_p3 = pnand %p756_p2, %p1020_p7  ;;  %p764_p8 = scmp.lt.s32.totalorder %s762_s7, %s755_s24 }
  0x28   : > { %p759_p4 = pneg %p758_p3  ;;  %p765_p10 = por %p764_p8, %p763_p6 }
  0x2a   : > { %p766_p11 = pnand %p765_p10, %p759_p4 }
  0x2c   : > { %769 = shalt.err (!%p766_p11)
}
  0x2d   : > { %691 = dma.hbm_to_vmem [thread:$0]  (!%p1000_p5), %s1009_s8, 128, %s1012_s10, %s1014_s11  }
  0x2e   : > { %s1045_s9 = sadd.s32 4294967295, %s921_s21   ;;  %p66_p9 = scmp.ne.s32.totalorder %s913_s19, %s909_s18 }
  0x2f   : > { %p1208_p12 = scmp.eq.s32.totalorder %s1045_s9, 0  ;;  %p637_p13 = scmp.ge.s32.totalorder %s921_s21, 1 }
  0x30   : > { %p181_p0 = scmp.lt.s32.totalorder %s921_s21, 3  ;;  %s1220_s0 = sld [smem:[#allocation15_spill]] }
  0x31   : > { %p1054_p1 = por %p1208_p12, %p66_p9  ;;  %s1073_s16 = scalar_lea.hbm %s1203_s1, %s998_s28 }
  0x32   : > { %p1061_p2 = pnand %p637_p13, %p181_p0  ;;  %s209_s17 = scalar_lea.vmem [#allocation5], %s995_s27 }
  0x33   : > { %s1219_s12 = scalar_select %p1054_p1, 1, 0 }
  0x34   : > { %s1221_s10 = scalar_select %p1061_p2, 1, 0 }
  0x35   : > { %p681_p3 = pneg %p1061_p2  ;;  %s216_s23 = sshll.u32 %s209_s17, 4  ;;  %s217_s23 = int_to_ptr.vmem [resolvable:$true] %s216_s23 }
  0x36   : > { %s194_s8 = sshll.u32 %s1220_s0, 4  ;;  %s206_s30 = scalar_lea.sflag [#allocation3], %s992_s26  ;;  %s1065_s8 = int_to_ptr.vmem [resolvable:$true] %s194_s8 }
  0x37   : > { %p1078_p4 = pnand %p681_p3, %p1208_p12  ;;  %s770_s6 = scalar_lea.hbm %s1073_s16, 128 }
  0x38   : > { %p771_p6 = scmp.ne.s32.totalorder %s1073_s16, %s770_s6  ;;  %s775_s15 = scalar_lea.hbm %s1203_s1, 256 }
  0x39   : > { %s1222_s24 = scalar_select %p1078_p4, 1, 0 }
  0x3a   : > { %p773_p8 = pnand %p771_p6, %p1020_p7  ;;  %p776_p11 = scmp.lt.u32.totalorder %s1073_s16, %s1203_s1 }
  0x3b   : > { %p777_p9 = scmp.lt.u32.totalorder %s775_s15, %s770_s6  ;;  %p779_p0 = scmp.lt.u32.totalorder %s770_s6, %s1073_s16 }
  0x3c   : > { %p774_p10 = pneg %p773_p8 }
  0x3d   : > { %p778_p13 = por %p777_p9, %p776_p11 }
  0x3f   : > { %p780_p3 = por %p779_p0, %p778_p13 }
  0x41   : > { %p781_p12 = pnand %p780_p3, %p774_p10 }
  0x43   : > { %784 = shalt.err (!%p781_p12)
}
  0x44   : > { %s785_s17 = scalar_lea.vmem %s217_s23, 128  ;;  %s924_s0 = smov [#allocation5]  }
  0x45   : > { %p786_p1 = scmp.ne.s32.totalorder %s217_s23, %s785_s17  ;;  %s790_s2 = sshll.u32 %s924_s0, 4  ;;  %s791_s2 = int_to_ptr.vmem [resolvable:$false] %s790_s2 }
  0x46   : > { %s792_s7 = scalar_lea.vmem %s791_s2, 256  ;;  %p793_p2 = scmp.lt.s32.totalorder %s217_s23, %s791_s2 }
  0x47   : > { %p788_p6 = pnand %p786_p1, %p1020_p7  ;;  %p794_p4 = scmp.lt.s32.totalorder %s792_s7, %s785_s17 }
  0x49   : > { %p789_p8 = pneg %p788_p6  ;;  %p795_p5 = por %p794_p4, %p793_p2 }
  0x4b   : > { %p796_p9 = pnand %p795_p5, %p789_p8 }
  0x4d   : > { %799 = shalt.err (!%p796_p9)
}
  0x4e   : > { %p1223_p11 = scmp.ne.s32.totalorder %s1216_s29, 0  ;;  %s800_s6 = scalar_lea.vmem %s1065_s8, 16 }
  0x4f   : > { %p801_p12 = scmp.ne.s32.totalorder %s1065_s8, %s800_s6  ;;  %p1224_p1 = scmp.ne.s32.totalorder %s1222_s24, 0 }
  0x50   : > { %688 = dma.hbm_to_vmem [thread:$0]  (!%p1223_p11), %s1073_s16, 128, %s217_s23, %s206_s30  }
  0x51   : > { %p802_p10 = pneg %p1224_p1  ;;  %p808_p3 = scmp.lt.s32.totalorder %s1065_s8, %s1065_s8 }
  0x52   : > { %p809_p6 = scmp.lt.s32.totalorder %s800_s6, %s800_s6 }
  0x53   : > { %p803_p13 = pnand %p802_p10, %p801_p12 }
  0x54   : > { %p810_p2 = por %p809_p6, %p808_p3 }
  0x55   : > { %p804_p0 = pneg %p803_p13 }
  0x57   : > { %p811_p5 = pnand %p810_p2, %p804_p0 }
  0x59   : > { %814 = shalt.err (!%p811_p5)
}
  0x5a   : > { %s925_s0 = smov [#allocation2]   ;;  %s1113_s23 = scalar_lea.hbm %s1205_s3, %s998_s28 }
  0x5b   : > { %684 = dma.vmem_to_smem (!%p1224_p1), %s1065_s8, 16, %s925_s0, [#allocation4]  }
  0x5c   : > { %s245_s30 = scalar_lea.vmem [#allocation8], %s995_s27  ;;  %s815_s15 = scalar_lea.hbm %s1113_s23, 128 }
  0x5d   : > { %s252_s14 = sshll.u32 %s245_s30, 4  ;;  %p816_p4 = scmp.ne.s32.totalorder %s1113_s23, %s815_s15  ;;  %s253_s14 = int_to_ptr.vmem [resolvable:$true] %s252_s14 }
  0x5e   : > { %s820_s8 = scalar_lea.hbm %s1205_s3, 256  ;;  %p821_p12 = scmp.lt.u32.totalorder %s1113_s23, %s1205_s3 }
  0x5f   : > { %p818_p8 = pnand %p816_p4, %p1020_p7  ;;  %p822_p1 = scmp.lt.u32.totalorder %s820_s8, %s815_s15 }
  0x60   : > { %p824_p13 = scmp.lt.u32.totalorder %s815_s15, %s1113_s23 }
  0x61   : > { %p819_p9 = pneg %p818_p8  ;;  %p823_p10 = por %p822_p1, %p821_p12 }
  0x63   : > { %p825_p0 = por %p824_p13, %p823_p10 }
  0x65   : > { %p826_p3 = pnand %p825_p0, %p819_p9 }
  0x67   : > { %829 = shalt.err (!%p826_p3)
}
  0x68   : > { %s830_s7 = scalar_lea.vmem %s253_s14, 128  ;;  %s926_s6 = smov [#allocation8]  }
  0x69   : > { %p831_p6 = scmp.ne.s32.totalorder %s253_s14, %s830_s7  ;;  %s835_s0 = sshll.u32 %s926_s6, 4  ;;  %s836_s0 = int_to_ptr.vmem [resolvable:$false] %s835_s0 }
  0x6a   : > { %s837_s2 = scalar_lea.vmem %s836_s0, 256  ;;  %p838_p4 = scmp.lt.s32.totalorder %s253_s14, %s836_s0 }
  0x6b   : > { %p833_p2 = pnand %p831_p6, %p1020_p7  ;;  %p839_p8 = scmp.lt.s32.totalorder %s837_s2, %s830_s7 }
  0x6d   : > { %p834_p5 = pneg %p833_p2  ;;  %p840_p11 = por %p839_p8, %p838_p4 }
  0x6f   : > { %p841_p1 = pnand %p840_p11, %p834_p5 }
  0x71   : > { %844 = shalt.err (!%p841_p1)
}
  0x72   : > { %p1225_p12 = scmp.ne.s32.totalorder %s1216_s29, 0  ;;  %s1138_s15 = scalar_lea.hbm %s1206_s4, %s998_s28 }
  0x73   : > { %s263_s24 = scalar_lea.vmem [#allocation9], %s995_s27  ;;  %s260_s8 = scalar_lea.sflag [#allocation10], %s992_s26 }
  0x74   : > { %694 = dma.hbm_to_vmem [thread:$0]  (!%p1225_p12), %s1113_s23, 128, %s253_s14, %s1014_s11  }
  0x75   : > { %s270_s18 = sshll.u32 %s263_s24, 4  ;;  %s845_s21 = scalar_lea.hbm %s1138_s15, 128  ;;  %s271_s18 = int_to_ptr.vmem [resolvable:$true] %s270_s18 }
  0x76   : > { %p846_p11 = scmp.ne.s32.totalorder %s1138_s15, %s845_s21  ;;  %s850_s23 = scalar_lea.hbm %s1206_s4, 256 }
  0x77   : > { %p851_p13 = scmp.lt.u32.totalorder %s1138_s15, %s1206_s4  ;;  %p852_p0 = scmp.lt.u32.totalorder %s850_s23, %s845_s21 }
  0x78   : > { %p848_p9 = pnand %p846_p11, %p1020_p7  ;;  %p854_p6 = scmp.lt.u32.totalorder %s845_s21, %s1138_s15 }
  0x79   : > { %p853_p3 = por %p852_p0, %p851_p13 }
  0x7a   : > { %p849_p10 = pneg %p848_p9 }
  0x7b   : > { %p855_p2 = por %p854_p6, %p853_p3 }
  0x7d   : > { %p856_p5 = pnand %p855_p2, %p849_p10 }
  0x7f   : > { %859 = shalt.err (!%p856_p5)
}
  0x80   : > { %s860_s26 = scalar_lea.vmem %s271_s18, 128  ;;  %s927_s27 = smov [#allocation9]  }
  0x81   : > { %p861_p4 = scmp.ne.s32.totalorder %s271_s18, %s860_s26  ;;  %s865_s7 = sshll.u32 %s927_s27, 4  ;;  %s866_s7 = int_to_ptr.vmem [resolvable:$false] %s865_s7 }
  0x82   : > { %s867_s6 = scalar_lea.vmem %s866_s7, 256  ;;  %p868_p11 = scmp.lt.s32.totalorder %s271_s18, %s866_s7 }
  0x83   : > { %p863_p8 = pnand %p861_p4, %p1020_p7  ;;  %p869_p9 = scmp.lt.s32.totalorder %s867_s6, %s860_s26 }
  0x85   : > { %p864_p1 = pneg %p863_p8  ;;  %p870_p12 = por %p869_p9, %p868_p11 }
  0x87   : > { %p871_p0 = pnand %p870_p12, %p864_p1 }
  0x89   : > { %874 = shalt.err (!%p871_p0)
}
  0x8a   : > { %p1226_p13 = scmp.ne.s32.totalorder %s1216_s29, 0  ;;  %p1227_p10 = scmp.ne.s32.totalorder %s1221_s10, 0 }
  0x8b   : > { %p1228_p3 = scmp.eq.s32.totalorder (!%p1227_p10), %s1045_s9, 0 }
  0x8c   : > { %697 = dma.hbm_to_vmem [thread:$0]  (!%p1226_p13), %s1138_s15, 128, %s271_s18, %s260_s8  }
  0x8d   : > { %279 = sbr.rel (%p1227_p10) target bundleno = 550 (0x226), region = 40 }
  0x94   : > { %892 = dma.done.wait (%p1228_p3), [#allocation4], 16   ;;  %p1229_p7 = pmov %p1228_p3 }
  0x95   : > { %s285_s13 = sand.u32 1, %s913_s19   ;;  %p1230_p12 = scmp.ne.s32.totalorder %s1219_s12, 0 }
  0x96   : > { %894 = vsyncadd (%p1229_p7), [#allocation4], 4294967280  ;;  %s650_s0 = sshll.u32 %s285_s13, 3  ;;  %s286_s2 = scalar_lea.sflag [#allocation3], %s285_s13 }
  0x97   : > { %s289_s16 = scalar_lea.vmem [#allocation5], %s650_s0 }
  0x98   : > { %896 = dma.done.wait (%p1230_p12), %s286_s2, 128  }
  0x99   : > { %898 = vsyncadd (%p1230_p12), %s286_s2, 4294967168  ;;  %s294_s29 = sand.u32 1, %s1045_s9   ;;  %s298_s30 = scalar_lea.vmem [#allocation6], %s650_s0 }
  0x9a   : > { %s295_s10 = scalar_lea.sflag [#allocation7], %s294_s29 }
  0x9b   : > { %900 = dma.done.wait (%p1230_p12), %s295_s10, 256  }
  0x9c   : > { %902 = vsyncadd (%p1230_p12), %s295_s10, 4294967040  ;;  %s307_s15 = scalar_lea.vmem [#allocation8], %s650_s0  ;;  %s313_s24 = scalar_lea.sflag [#allocation10], %s285_s13 }
  0x9d   : > { %s316_s18 = scalar_lea.vmem [#allocation9], %s650_s0 }
  0x9e   : > { %904 = dma.done.wait (%p1230_p12), %s313_s24, 128  }
  0x9f   : > { %906 = vsyncadd (%p1230_p12), %s313_s24, 4294967168 }
  0xa0   : > { %321 = sfence }
  0xa1   : > { %v362_v0 = vld [vmem:[%s289_s16] sm:$0xff]  ;;  %v365_v1 = vld [vmem:[%s316_s18] sm:$0xff]  ;;  %s402_s12 = sld [smem:[#allocation2]]  ;;  %s656_s8 = sld [smem:[#allocation2 + $0x2]]  ;;  %vm408_vm5 = vcmask 7168  }
  0xa2   : > { %v363_v2 = vld [vmem:[%s298_s30] sm:$0xff]  ;;  %v390_v3 = vsub.f32 %v362_v0, %v365_v1  ;;  %v364_v5 = vld [vmem:[%s307_s15] sm:$0xff]  ;;  %s655_s21 = sld [smem:[#allocation2 + $0x1]]  ;;  %p358_p6 = scmp.lt.s32.totalorder %s1045_s9, 1 }
  0xa3   : > { %v366_v4 = vsub.f32 %v362_v0, %v363_v2  ;;  %v378_v6 = vsub.f32 %v362_v0, %v364_v5 }
  0xa4   : > { %v391_v7 = vadd.f32 1e-06, %v390_v3  ;;  %s1236_s9 = smov (!%p358_p6, %s1045_s9), 1 }
  0xa5   : > { %v367_v8 = vadd.f32 1e-06, %v366_v4  ;;  %v379_v9 = vadd.f32 1e-06, %v378_v6  ;;  %s654_s28 = sshll.u32 %s1236_s9, 3 }
  0xa6   : > { %v392_v10 = vmul.f32 %v391_v7, %v391_v7  ;;  %s361_s6 = scalar_lea.vmem %s1207_s5, %s654_s28 }
  0xa7   : > { %v368_v11 = vmul.f32 %v367_v8, %v367_v8  ;;  %v380_v12 = vmul.f32 %v379_v9, %v379_v9  ;;  %v405_v18 = vstv %s402_s12  ;;  %v432_v22 = vstv %s656_s8 }
  0xa8   : > { %393 = vadd.xlane.f32.xlu1 %v392_v10  ;;  %v419_v30 = vstv %s655_s21 }
  0xa9   : > { %369 = vadd.xlane.f32.xlu0 %v368_v11 }
  0xad   : > { %381 = vadd.xlane.f32.xlu0 %v380_v12 }
 0x135   : > { %v394_v13 = vpop.xlane.xlu1 %393 }
 0x136   : > { %v370_v14 = vpop.xlane.xlu0 %369  ;;  %734 = vrsqrt.f32 %v394_v13  ;;  %vm397_vm0 = vcmp.eq.f32.partialorder %v394_v13, inf  ;;  %v400_v21 = vand.u32 2147483648, %v394_v13  ;;  %vm399_vm2 = vcmp.eq.f32.partialorder %v394_v13, 0.0 }
 0x137   : > { %736 = vrsqrt.f32 %v370_v14  ;;  %vm373_vm1 = vcmp.eq.f32.partialorder %v370_v14, inf  ;;  %v376_v23 = vand.u32 2147483648, %v370_v14  ;;  %vm375_vm3 = vcmp.eq.f32.partialorder %v370_v14, 0.0 }
 0x13a   : > { %v382_v15 = vpop.xlane.xlu0 %381 }
 0x13b   : > { %738 = vrsqrt.f32 %v382_v15  ;;  %vm385_vm4 = vcmp.eq.f32.partialorder %v382_v15, inf  ;;  %v388_v33 = vand.u32 2147483648, %v382_v15  ;;  %vm387_vm6 = vcmp.eq.f32.partialorder %v382_v15, 0.0 }
 0x140   : > { %v735_v16 = vpop.eup %734 }
 0x141   : > { %v737_v17 = vpop.eup %736  ;;  %v396_v19 = vmul.f32 %v735_v16, %v394_v13 }
 0x142   : > { %v372_v20 = vmul.f32 %v737_v17, %v370_v14 }
 0x143   : > { %v398_v24 = vsel %vm397_vm0, %v394_v13, %v396_v19 }
 0x144   : > { %v374_v26 = vsel %vm373_vm1, %v370_v14, %v372_v20  ;;  %v401_v27 = vsel %vm399_vm2, %v400_v21, %v398_v24 }
 0x145   : > { %v739_v25 = vpop.eup %738  ;;  %v377_v29 = vsel %vm375_vm3, %v376_v23, %v374_v26  ;;  %v433_v32 = vsub.f32 %v432_v22, %v401_v27  ;;  %v471_v22 = vlaneseq }
 0x146   : > { %v384_v28 = vmul.f32 %v739_v25, %v382_v15  ;;  %v406_v31 = vsub.f32 %v405_v18, %v377_v29 }
 0x147   : > { %v434_v41 = vmul.f32 %v433_v32, %v433_v32  ;;  %v472_v23 = vand.u32 127, %v471_v22 }
 0x148   : > { %v386_v34 = vsel %vm385_vm4, %v382_v15, %v384_v28  ;;  %v407_v35 = vmul.f32 %v406_v31, %v406_v31 }
 0x149   : > { %v389_v36 = vsel %vm387_vm6, %v388_v33, %v386_v34  ;;  %v435_v47 = vsel %vm408_vm5, %v434_v41, 0.0  ;;  %vm473_vm7 = vcmp.eq.s32.totalorder %v472_v23, 0  ;;  %vm476_vm8 = vcmp.eq.s32.totalorder %v472_v23, 1 }
 0x14a   : > { %v420_v37 = vsub.f32 %v419_v30, %v389_v36  ;;  %v458_v38 = vsub.f32 %v389_v36, %v401_v27  ;;  %v445_v39 = vsub.f32 %v377_v29, %v389_v36  ;;  %v409_v40 = vsel %vm408_vm5, %v407_v35, 0.0 }
 0x14b   : > { %410 = vadd.xlane.f32.xlu1 %v409_v40  ;;  %vm480_vm9 = vcmp.eq.s32.totalorder %v472_v23, 2  ;;  %vm484_vm10 = vcmp.eq.s32.totalorder %v472_v23, 3  ;;  %vm488_vm11 = vcmp.eq.s32.totalorder %v472_v23, 4 }
 0x14c   : > { %v421_v42 = vmul.f32 %v420_v37, %v420_v37  ;;  %v459_v43 = vadd.f32 3.0, %v458_v38  ;;  %v446_v44 = vadd.f32 0.5, %v445_v39 }
 0x14e   : > { %v422_v45 = vsel %vm408_vm5, %v421_v42, 0.0  ;;  %v447_v46 = vmax.f32 %v446_v44, 0.0  ;;  %v460_v48 = vmax.f32 %v459_v43, 0.0 }
 0x14f   : > { %423 = vadd.xlane.f32.xlu0 %v422_v45  ;;  %436 = vadd.xlane.f32.xlu1 %v435_v47 }
 0x150   : > { %v448_v49 = vsel %vm408_vm5, %v447_v46, 0.0  ;;  %v461_v50 = vsel %vm408_vm5, %v460_v48, 0.0 }
 0x153   : > { %449 = vadd.xlane.f32.xlu0 %v448_v49  ;;  %462 = vadd.xlane.f32.xlu1 %v461_v50 }
 0x1d8   : > { %v411_v51 = vpop.xlane.xlu1 %410 }
 0x1d9   : > { %v412_v52 = vrot.slane %v411_v51, 4 }
 0x1db   : > { %v413_v53 = vadd.f32 %v412_v52, %v411_v51 }
 0x1dc   : > { %v424_v54 = vpop.xlane.xlu0 %423  ;;  %v437_v55 = vpop.xlane.xlu1 %436 }
 0x1dd   : > { %v425_v56 = vrot.slane %v424_v54, 4  ;;  %v414_v57 = vrot.slane %v413_v53, 2  ;;  %v438_v58 = vrot.slane %v437_v55, 4 }
 0x1df   : > { %v426_v59 = vadd.f32 %v425_v56, %v424_v54  ;;  %v439_v60 = vadd.f32 %v438_v58, %v437_v55  ;;  %v415_v62 = vadd.f32 %v414_v57, %v413_v53 }
 0x1e0   : > { %v450_v61 = vpop.xlane.xlu0 %449  ;;  %v463_v0 = vpop.xlane.xlu1 %462 }
 0x1e1   : > { %v427_v63 = vrot.slane %v426_v59, 2  ;;  %v451_v1 = vrot.slane %v450_v61, 4  ;;  %v440_v2 = vrot.slane %v439_v60, 2  ;;  %v464_v3 = vrot.slane %v463_v0, 4 }
 0x1e2   : > { %v416_v4 = vrot.slane %v415_v62, 1 }
 0x1e3   : > { %v452_v5 = vadd.f32 %v451_v1, %v450_v61  ;;  %v428_v6 = vadd.f32 %v427_v63, %v426_v59  ;;  %v465_v7 = vadd.f32 %v464_v3, %v463_v0  ;;  %v441_v9 = vadd.f32 %v440_v2, %v439_v60 }
 0x1e4   : > { %v417_v8 = vadd.f32 %v416_v4, %v415_v62 }
 0x1e5   : > { %v453_v10 = vrot.slane %v452_v5, 2  ;;  %v429_v11 = vrot.slane %v428_v6, 1  ;;  %v466_v12 = vrot.slane %v465_v7, 2  ;;  %v442_v13 = vrot.slane %v441_v9, 1 }
 0x1e6   : > { %659 = vpush %v417_v8 }
 0x1e7   : > { %v454_v14 = vadd.f32 %v453_v10, %v452_v5  ;;  %v430_v15 = vadd.f32 %v429_v11, %v428_v6  ;;  %v467_v16 = vadd.f32 %v466_v12, %v465_v7  ;;  %v443_v17 = vadd.f32 %v442_v13, %v441_v9 }
 0x1e9   : > { %661 = vpush %v430_v15  ;;  %v455_v18 = vrot.slane %v454_v14, 1  ;;  %v468_v19 = vrot.slane %v467_v16, 1 }
 0x1ea   : > { %663 = vpush %v443_v17 }
 0x1eb   : > { %v456_v20 = vadd.f32 %v455_v18, %v454_v14  ;;  %v469_v21 = vadd.f32 %v468_v19, %v467_v16 }
 0x1ed   : > { %665 = vpush %v456_v20 }
 0x1ee   : > { %667 = vpush %v469_v21 }
 0x217   : > { %s660_s17 = spop %659 }
 0x218   : > { %v474_v24 = vstv %s660_s17 }
 0x219   : > { %v475_v26 = vsel %vm473_vm7, %v474_v24, 0.0 }
 0x21a   : > { %s662_s11 = spop %661 }
 0x21b   : > { %v477_v25 = vstv %s662_s11  ;;  %s664_s23 = spop %663 }
 0x21c   : > { %v478_v27 = vsel %vm476_vm8, %v477_v25, 0.0  ;;  %v481_v28 = vstv %s664_s23 }
 0x21d   : > { %v479_v29 = vadd.f32 %v478_v27, %v475_v26  ;;  %v482_v30 = vsel %vm480_vm9, %v481_v28, 0.0 }
 0x21e   : > { %s666_s14 = spop %665 }
 0x21f   : > { %v483_v31 = vadd.f32 %v482_v30, %v479_v29  ;;  %v485_v32 = vstv %s666_s14  ;;  %s668_s26 = spop %667 }
 0x220   : > { %v486_v33 = vsel %vm484_vm10, %v485_v32, 0.0  ;;  %v489_v34 = vstv %s668_s26 }
 0x221   : > { %v487_v35 = vadd.f32 %v486_v33, %v483_v31  ;;  %v490_v36 = vsel %vm488_vm11, %v489_v34, 0.0 }
 0x223   : > { %v491_v37 = vadd.f32 %v490_v36, %v487_v35 }
 0x225   : > { %492 = vst [vmem:[%s361_s6] sm:$0xff] %v491_v37 }
 0x226 PF: > { %p22_p2 = scmp.ge.s32.totalorder %s979_s22, 4   ;;  %s1231_s18 = smov %s913_s19 }
 0x227   : > { %s1232_s19 = smov %s917_s20  ;;  %s1233_s20 = smov %s989_s25 }
 0x228   : > { %s1234_s21 = smov %s979_s22  ;;  %24 = sbr.rel (!%p22_p2) target bundleno = 11 (0xb), region = 122 }
 0x22f   :  { %512 = vsyncpa [#allocation3], 1 }
 0x230   :  { %514 = vsyncpa [#allocation3 + $0x1], 1 }
 0x231   :  { %515 = vsyncpa [#allocation7], 1 }
 0x232   :  { %517 = vsyncpa [#allocation7 + $0x1], 1 }
 0x233   :  { %518 = vsyncpa [#allocation10], 1 }
 0x234   :  { %520 = vsyncpa [#allocation10 + $0x1], 1 }
 0x235   :  { %521 = vsyncpa [#allocation4], 1 }
 0x236   :  { %523 = vsyncpa [#allocation4 + $0x1], 1 }

</bundles_post_ra>
